<compile_context>
chip_gen: v5e
topology: v5e:2x2
jax: 0.10.0
libtpu: 0.0.40
codegen_flags: <defaults>
</compile_context>

<pallas_src>
import jax
import jax.numpy as jnp
from jax.experimental import pallas as pl

B, S, D = 2, 8, 32          # small shapes consistent with the module's intent
DROP_P = 0.15
INV_KEEP = 1.0 / (1.0 - DROP_P)
SCALE = 1.0 / 0.06
EPS = 1e-5


def _layernorm(x, gamma, beta):
    mean = jnp.mean(x, axis=-1, keepdims=True)
    var = jnp.mean(jnp.square(x - mean), axis=-1, keepdims=True)
    return (x - mean) * jax.lax.rsqrt(var + EPS) * gamma + beta


def sfdp_kernel(x1_ref, w_ref, b_ref, g1_ref, be1_ref, g2_ref, be2_ref,
                x2_ref, u_ref, v9_ref, nsq_ref):
    # Single invocation: full (B, S, D) tensors are resident in VMEM.
    x1 = x1_ref[...]                                  # (B, S, D) f32
    w = w_ref[...]                                    # (D, D) pre-transposed (in, out)

    # v2 = linear_in(x1): flatten leading dims (layout-preserving reshape) and
    # do a single 2-D MXU matmul; bias/LN params broadcast once.
    x1f = x1.reshape(B * S, D)                        # (16, 32)
    v2 = jnp.dot(x1f, w, preferred_element_type=jnp.float32) + b_ref[...]

    # v3 / v4 = two layernorms of v2
    v3 = _layernorm(v2, g1_ref[...], be1_ref[...]).reshape(B, S, D)
    v4 = _layernorm(v2, g2_ref[...], be2_ref[...]).reshape(B, S, D)

    # v5/v6 = (v3 @ v4^T) / 0.06 — batched contraction on the last dims (no .T)
    s = jnp.einsum("bqd,bkd->bqk", v3, v4,
                   preferred_element_type=jnp.float32) * SCALE   # (B, S, S)

    # v7 = softmax(dim=-1), numerically stable
    s = s - jnp.max(s, axis=-1, keepdims=True)
    e = jnp.exp(s)
    p = e / jnp.sum(e, axis=-1, keepdims=True)

    # v8 = dropout(p, 0.15, training=True): uniforms precomputed in the wrapper
    # (on-chip PRNG has no interpreter lowering); single compare + select here.
    p = jnp.where(u_ref[...] >= DROP_P, p * INV_KEEP, 0.0)

    # v9 = p @ x2
    v9 = jnp.einsum("bqk,bkd->bqd", p, x2_ref[...],
                    preferred_element_type=jnp.float32)          # (B, S, D)
    v9_ref[...] = v9

    # v10 partial: ||v9||^2 folded into the kernel (avoids a second HBM pass).
    nsq_ref[...] = jnp.sum(v9 * v9).reshape(1, 1)


def _forward_pallas(x1, x2, w_in_t, b_in, g1, be1, g2, be2, u):
    # No grid: one kernel invocation, whole arrays as VMEM blocks.
    return pl.pallas_call(
        sfdp_kernel,
        out_shape=(jax.ShapeDtypeStruct((B, S, D), jnp.float32),   # v9
                   jax.ShapeDtypeStruct((1, 1), jnp.float32)),     # ||v9||^2
    )(x1, w_in_t, b_in, g1, be1, g2, be2, x2, u)


@jax.jit
def model_forward(x1, x2, params, dropout_key):
    """Mirrors Model.forward: runs the attention-like hot path, returns (x1, x2)."""
    u = jax.random.uniform(dropout_key, (B, S, S), jnp.float32)
    v9, nsq = _forward_pallas(
        x1, x2,
        params["w_in"].T,            # pre-transpose torch (out,in) -> (in,out)
        params["b_in"],
        params["ln1_g"], params["ln1_b"],
        params["ln2_g"], params["ln2_b"],
        u)
    v10 = jnp.sqrt(nsq[0, 0])        # v9.norm() — computed, never returned by Model
    return (x1, x2), v9, v10


def init_params(key):
    k1, k2 = jax.random.split(key, 2)
    return {
        "w_in": jax.random.normal(k1, (D, D), jnp.float32) * (1.0 / jnp.sqrt(D)),
        "b_in": jax.random.normal(k2, (1, D), jnp.float32) * 0.01,
        "ln1_g": jnp.ones((1, D), jnp.float32),
        "ln1_b": jnp.zeros((1, D), jnp.float32),
        "ln2_g": jnp.ones((1, D), jnp.float32) * 1.5,
        "ln2_b": jnp.full((1, D), 0.1, jnp.float32),
    }
    # TODO(synk): the torch module's nn.Embedding() (v1) is constructed without
    # args and never fed inputs — uncallable/unused in the original, so omitted.


if __name__ == "__main__":
    key = jax.random.PRNGKey(0)
    kx1, kx2, kp, kd = jax.random.split(key, 4)
    x1 = jax.random.normal(kx1, (B, S, D), jnp.float32)
    x2 = jax.random.normal(kx2, (B, S, D), jnp.float32)
    params = init_params(kp)

    (out_x1, out_x2), v9, v10 = model_forward(x1, x2, params, kd)
    jax.block_until_ready((out_x1, out_x2, v9, v10))

    assert out_x1.shape == (B, S, D) and out_x2.shape == (B, S, D)
    assert v9.shape == (B, S, D)
    assert v10.shape == ()
    assert bool(jnp.isfinite(v10))
    print("KERNEL_OK")
</pallas_src>

<mosaic_0001>
module attributes {stable_mosaic.version = 11 : i64} {
  func.func @sfdp_kernel(%arg0: memref<2x8x32xf32, #tpu.memory_space<vmem>>, %arg1: memref<32x32xf32, #tpu.memory_space<vmem>>, %arg2: memref<1x32xf32, #tpu.memory_space<vmem>>, %arg3: memref<1x32xf32, #tpu.memory_space<vmem>>, %arg4: memref<1x32xf32, #tpu.memory_space<vmem>>, %arg5: memref<1x32xf32, #tpu.memory_space<vmem>>, %arg6: memref<1x32xf32, #tpu.memory_space<vmem>>, %arg7: memref<2x8x32xf32, #tpu.memory_space<vmem>>, %arg8: memref<2x8x8xf32, #tpu.memory_space<vmem>>, %arg9: memref<2x8x32xf32, #tpu.memory_space<vmem>>, %arg10: memref<1x1xf32, #tpu.memory_space<vmem>>) attributes {dimension_semantics = [], scalar_prefetch = 0 : i64, scratch_operands = 0 : i64, tpu.core_type = #tpu.core_type<tc>} {
    %c0 = arith.constant 0 : index
    %c0_0 = arith.constant 0 : index
    %c0_1 = arith.constant 0 : index
    %0 = vector.load %arg0[%c0, %c0_0, %c0_1] : memref<2x8x32xf32, #tpu.memory_space<vmem>>, vector<2x8x32xf32>
    %c0_2 = arith.constant 0 : index
    %c0_3 = arith.constant 0 : index
    %1 = vector.load %arg1[%c0_2, %c0_3] : memref<32x32xf32, #tpu.memory_space<vmem>>, vector<32x32xf32>
    %2 = vector.shape_cast %0 : vector<2x8x32xf32> to vector<16x32xf32>
    %cst = arith.constant dense<0.000000e+00> : vector<16x32xf32>
    %3 = tpu.matmul %2, %1, %cst {dimension_numbers = #tpu.dot_dimension_numbers<[1], [0], [0], [1], [0, 0, 1, 1], [], []>} : vector<16x32xf32>, vector<32x32xf32>, vector<16x32xf32> -> vector<16x32xf32>
    %c0_4 = arith.constant 0 : index
    %c0_5 = arith.constant 0 : index
    %4 = vector.load %arg2[%c0_4, %c0_5] : memref<1x32xf32, #tpu.memory_space<vmem>>, vector<1x32xf32>
    %5 = vector.broadcast %4 : vector<1x32xf32> to vector<16x32xf32>
    %6 = arith.addf %3, %5 : vector<16x32xf32>
    %c0_6 = arith.constant 0 : index
    %c0_7 = arith.constant 0 : index
    %7 = vector.load %arg3[%c0_6, %c0_7] : memref<1x32xf32, #tpu.memory_space<vmem>>, vector<1x32xf32>
    %c0_8 = arith.constant 0 : index
    %c0_9 = arith.constant 0 : index
    %8 = vector.load %arg4[%c0_8, %c0_9] : memref<1x32xf32, #tpu.memory_space<vmem>>, vector<1x32xf32>
    %cst_10 = arith.constant dense<0.000000e+00> : vector<16xf32>
    %9 = vector.multi_reduction <add>, %6, %cst_10 [1] : vector<16x32xf32> to vector<16xf32>
    %10 = vector.shape_cast %9 : vector<16xf32> to vector<16x1xf32>
    %cst_11 = arith.constant 3.200000e+01 : f32
    %11 = vector.broadcast %cst_11 : f32 to vector<16x1xf32>
    %12 = arith.divf %10, %11 : vector<16x1xf32>
    %13 = vector.broadcast %12 : vector<16x1xf32> to vector<16x32xf32>
    %14 = arith.subf %6, %13 : vector<16x32xf32>
    %15 = arith.mulf %14, %14 : vector<16x32xf32>
    %cst_12 = arith.constant dense<0.000000e+00> : vector<16xf32>
    %16 = vector.multi_reduction <add>, %15, %cst_12 [1] : vector<16x32xf32> to vector<16xf32>
    %17 = vector.shape_cast %16 : vector<16xf32> to vector<16x1xf32>
    %cst_13 = arith.constant 3.200000e+01 : f32
    %18 = vector.broadcast %cst_13 : f32 to vector<16x1xf32>
    %19 = arith.divf %17, %18 : vector<16x1xf32>
    %20 = vector.broadcast %12 : vector<16x1xf32> to vector<16x32xf32>
    %21 = arith.subf %6, %20 : vector<16x32xf32>
    %cst_14 = arith.constant 9.99999974E-6 : f32
    %22 = vector.broadcast %cst_14 : f32 to vector<16x1xf32>
    %23 = arith.addf %19, %22 : vector<16x1xf32>
    %24 = math.rsqrt %23 : vector<16x1xf32>
    %25 = vector.broadcast %24 : vector<16x1xf32> to vector<16x32xf32>
    %26 = arith.mulf %21, %25 : vector<16x32xf32>
    %27 = vector.broadcast %7 : vector<1x32xf32> to vector<16x32xf32>
    %28 = arith.mulf %26, %27 : vector<16x32xf32>
    %29 = vector.broadcast %8 : vector<1x32xf32> to vector<16x32xf32>
    %30 = arith.addf %28, %29 : vector<16x32xf32>
    %31 = vector.shape_cast %30 : vector<16x32xf32> to vector<2x8x32xf32>
    %c0_15 = arith.constant 0 : index
    %c0_16 = arith.constant 0 : index
    %32 = vector.load %arg5[%c0_15, %c0_16] : memref<1x32xf32, #tpu.memory_space<vmem>>, vector<1x32xf32>
    %c0_17 = arith.constant 0 : index
    %c0_18 = arith.constant 0 : index
    %33 = vector.load %arg6[%c0_17, %c0_18] : memref<1x32xf32, #tpu.memory_space<vmem>>, vector<1x32xf32>
    %cst_19 = arith.constant dense<0.000000e+00> : vector<16xf32>
    %34 = vector.multi_reduction <add>, %6, %cst_19 [1] : vector<16x32xf32> to vector<16xf32>
    %35 = vector.shape_cast %34 : vector<16xf32> to vector<16x1xf32>
    %cst_20 = arith.constant 3.200000e+01 : f32
    %36 = vector.broadcast %cst_20 : f32 to vector<16x1xf32>
    %37 = arith.divf %35, %36 : vector<16x1xf32>
    %38 = vector.broadcast %37 : vector<16x1xf32> to vector<16x32xf32>
    %39 = arith.subf %6, %38 : vector<16x32xf32>
    %40 = arith.mulf %39, %39 : vector<16x32xf32>
    %cst_21 = arith.constant dense<0.000000e+00> : vector<16xf32>
    %41 = vector.multi_reduction <add>, %40, %cst_21 [1] : vector<16x32xf32> to vector<16xf32>
    %42 = vector.shape_cast %41 : vector<16xf32> to vector<16x1xf32>
    %cst_22 = arith.constant 3.200000e+01 : f32
    %43 = vector.broadcast %cst_22 : f32 to vector<16x1xf32>
    %44 = arith.divf %42, %43 : vector<16x1xf32>
    %45 = vector.broadcast %37 : vector<16x1xf32> to vector<16x32xf32>
    %46 = arith.subf %6, %45 : vector<16x32xf32>
    %cst_23 = arith.constant 9.99999974E-6 : f32
    %47 = vector.broadcast %cst_23 : f32 to vector<16x1xf32>
    %48 = arith.addf %44, %47 : vector<16x1xf32>
    %49 = math.rsqrt %48 : vector<16x1xf32>
    %50 = vector.broadcast %49 : vector<16x1xf32> to vector<16x32xf32>
    %51 = arith.mulf %46, %50 : vector<16x32xf32>
    %52 = vector.broadcast %32 : vector<1x32xf32> to vector<16x32xf32>
    %53 = arith.mulf %51, %52 : vector<16x32xf32>
    %54 = vector.broadcast %33 : vector<1x32xf32> to vector<16x32xf32>
    %55 = arith.addf %53, %54 : vector<16x32xf32>
    %56 = vector.shape_cast %55 : vector<16x32xf32> to vector<2x8x32xf32>
    "tpu.trace_start"() <{level = 10 : i32, message = "bqd,bkd->bqk"}> : () -> ()
    %cst_24 = arith.constant dense<0.000000e+00> : vector<2x8x8xf32>
    %57 = tpu.matmul %31, %56, %cst_24 {dimension_numbers = #tpu.dot_dimension_numbers<[2], [2], [1], [1], [0, 0, 0, 1, 1, 1], [0], [0]>} : vector<2x8x32xf32>, vector<2x8x32xf32>, vector<2x8x8xf32> -> vector<2x8x8xf32>
    "tpu.trace_stop"() : () -> ()
    %cst_25 = arith.constant 16.666666 : f32
    %58 = vector.broadcast %cst_25 : f32 to vector<2x8x8xf32>
    %59 = arith.mulf %57, %58 : vector<2x8x8xf32>
    %cst_26 = arith.constant dense<0xFF800000> : vector<2x8xf32>
    %60 = vector.multi_reduction <maximumf>, %59, %cst_26 [2] : vector<2x8x8xf32> to vector<2x8xf32>
    %61 = vector.shape_cast %60 : vector<2x8xf32> to vector<2x8x1xf32>
    %62 = vector.broadcast %61 : vector<2x8x1xf32> to vector<2x8x8xf32>
    %63 = arith.subf %59, %62 : vector<2x8x8xf32>
    %64 = math.exp %63 : vector<2x8x8xf32>
    %cst_27 = arith.constant dense<0.000000e+00> : vector<2x8xf32>
    %65 = vector.multi_reduction <add>, %64, %cst_27 [2] : vector<2x8x8xf32> to vector<2x8xf32>
    %66 = vector.shape_cast %65 : vector<2x8xf32> to vector<2x8x1xf32>
    %67 = vector.broadcast %66 : vector<2x8x1xf32> to vector<2x8x8xf32>
    %68 = arith.divf %64, %67 : vector<2x8x8xf32>
    %c0_28 = arith.constant 0 : index
    %c0_29 = arith.constant 0 : index
    %c0_30 = arith.constant 0 : index
    %69 = vector.load %arg8[%c0_28, %c0_29, %c0_30] : memref<2x8x8xf32, #tpu.memory_space<vmem>>, vector<2x8x8xf32>
    %cst_31 = arith.constant 1.500000e-01 : f32
    %70 = vector.broadcast %cst_31 : f32 to vector<2x8x8xf32>
    %71 = arith.cmpf oge, %69, %70 : vector<2x8x8xf32>
    %cst_32 = arith.constant 1.17647064 : f32
    %72 = vector.broadcast %cst_32 : f32 to vector<2x8x8xf32>
    %73 = arith.mulf %68, %72 : vector<2x8x8xf32>
    %cst_33 = arith.constant 0.000000e+00 : f32
    %74 = vector.broadcast %cst_33 : f32 to vector<2x8x8xf32>
    %75 = arith.select %71, %73, %74 : vector<2x8x8xi1>, vector<2x8x8xf32>
    %c0_34 = arith.constant 0 : index
    %c0_35 = arith.constant 0 : index
    %c0_36 = arith.constant 0 : index
    %76 = vector.load %arg7[%c0_34, %c0_35, %c0_36] : memref<2x8x32xf32, #tpu.memory_space<vmem>>, vector<2x8x32xf32>
    "tpu.trace_start"() <{level = 10 : i32, message = "bqk,bkd->bqd"}> : () -> ()
    %cst_37 = arith.constant dense<0.000000e+00> : vector<2x8x32xf32>
    %77 = tpu.matmul %75, %76, %cst_37 {dimension_numbers = #tpu.dot_dimension_numbers<[2], [1], [1], [2], [0, 0, 0, 1, 1, 2], [0], [0]>} : vector<2x8x8xf32>, vector<2x8x32xf32>, vector<2x8x32xf32> -> vector<2x8x32xf32>
    "tpu.trace_stop"() : () -> ()
    %c0_38 = arith.constant 0 : index
    %c0_39 = arith.constant 0 : index
    %c0_40 = arith.constant 0 : index
    %78 = vector.load %arg9[%c0_38, %c0_39, %c0_40] : memref<2x8x32xf32, #tpu.memory_space<vmem>>, vector<2x8x32xf32>
    tpu.vector_store %arg9[%c0_38, %c0_39, %c0_40], %77 {strides = array<i32>} : memref<2x8x32xf32, #tpu.memory_space<vmem>>, vector<2x8x32xf32>,
    %79 = arith.mulf %77, %77 : vector<2x8x32xf32>
    %80 = vector.shape_cast %79 : vector<2x8x32xf32> to vector<1x2x8x32xf32>
    %cst_41 = arith.constant dense<0.000000e+00> : vector<1xf32>
    %81 = vector.multi_reduction <add>, %80, %cst_41 [1, 2, 3] : vector<1x2x8x32xf32> to vector<1xf32>
    %82 = vector.shape_cast %81 : vector<1xf32> to vector<1x1x1x1xf32>
    %83 = vector.extract %82[0, 0, 0, 0] : f32 from vector<1x1x1x1xf32>
    %84 = vector.broadcast %83 : f32 to vector<1x1xf32>
    %c0_42 = arith.constant 0 : index
    %c0_43 = arith.constant 0 : index
    %85 = vector.load %arg10[%c0_42, %c0_43] : memref<1x1xf32, #tpu.memory_space<vmem>>, vector<1x1xf32>
    tpu.vector_store %arg10[%c0_42, %c0_43], %84 {strides = array<i32>} : memref<1x1xf32, #tpu.memory_space<vmem>>, vector<1x1xf32>,
    return
  }
}

</mosaic_0001>

<bundles_post_ra>
// kernel: model_forward.1
= control target key start
LH: loop header
LB: loop body
LE: loop exit
PB: predicated region body
PF: predicated region fallthrough
CT: control target
= control target key end

     0   :  { %16 = vsyncpa [#allocation3], 0  ;;  %s580_s0 = inlined_call_operand.vmem [shape: f32[2,8,32], index: 0, kind: input, shape index: {}]   ;;  %s581_s1 = inlined_call_operand.vmem [shape: f32[32,32], index: 1, kind: input, shape index: {}]   ;;  %s582_s2 = inlined_call_operand.vmem [shape: f32[1,32], index: 2, kind: input, shape index: {}]   ;;  %s583_s3 = inlined_call_operand.vmem [shape: f32[1,32], index: 3, kind: input, shape index: {}]   ;;  %s584_s4 = inlined_call_operand.vmem [shape: f32[1,32], index: 4, kind: input, shape index: {}]   ;;  %s585_s5 = inlined_call_operand.vmem [shape: f32[1,32], index: 5, kind: input, shape index: {}]   ;;  %s586_s6 = inlined_call_operand.vmem [shape: f32[1,32], index: 6, kind: input, shape index: {}]   ;;  %s587_s7 = inlined_call_operand.vmem [shape: f32[2,8,32], index: 7, kind: input, shape index: {}]   ;;  %s588_s8 = inlined_call_operand.vmem [shape: f32[2,8,8], index: 8, kind: input, shape index: {}]   ;;  %s589_s9 = inlined_call_operand.hbm [shape: f32[2,8,32], index: 9, kind: output, shape index: {0}]   ;;  %s590_s10 = inlined_call_operand.hbm [shape: f32[1,1], index: 10, kind: output, shape index: {1}]  }
   0x1   :  { %v41_v0 = vld [vmem:[%s581_s1 + $0x18] sm:$0xff]  ;;  %v40_v1 = vld [vmem:[%s581_s1 + $0x10] sm:$0xff]  ;;  %v39_v2 = vld [vmem:[%s581_s1 + $0x8] sm:$0xff] }
   0x2   :  { %65 = vmatpush.msra.mxu0 %v41_v0  ;;  %v38_v3 = vld [vmem:[%s581_s1] sm:$0xff] }
   0x4   :  { %66 = vmatpush.msra.mxu0 %v40_v1 }
   0x5   :  { %17 = vsyncpa [#allocation5], 0  ;;  %v36_v4 = vld [vmem:[%s580_s0] sm:$0xff]  ;;  %vm46_vm0 = vcmask 261120   ;;  %v37_v5 = vld [vmem:[%s580_s0 + $0x8] sm:$0xff]  ;;  %v449_v13 = vmov 32.0  }
   0x6   :  { %67 = vmatpush.msra.mxu0 %v39_v2  ;;  %v378_v6 = vld [vmem:[%s582_s2] ss:$0 sm:$0xff]  ;;  %383 = vrcp.f32 %v449_v13  ;;  %vm205_vm8 = vcmask 64512   ;;  %s335_s18 = sshll.u32 %s589_s9, 4  ;;  %s451_s19 = smov 128   ;;  %s336_s18 = int_to_ptr.hbm [resolvable:$true] %s335_s18 }
   0x7   :  { %v379_v44 = vld [vmem:[%s585_s5] ss:$0 sm:$0xff]  ;;  %s452_s20 = smov 8   ;;  %s453_s21 = smov [#allocation4]  }
   0x8   :  { %68 = vmatpush.msra.mxu0 %v38_v3  ;;  %v381_v47 = vld [vmem:[%s583_s3] ss:$0 sm:$0xff]  ;;  %s347_s22 = sshll.u32 %s453_s21, 4  ;;  %s349_s25 = sshll.u32 %s590_s10, 4  ;;  %s348_s22 = int_to_ptr.vmem [resolvable:$true] %s347_s22  ;;  %s350_s25 = int_to_ptr.hbm [resolvable:$true] %s349_s25 }
   0x9   :  { %363 = vmatmul.msk.f32.vlgmr.msra.gmra.mxu0 %vm46_vm0, %v36_v4  ;;  %v380_v49 = vld [vmem:[%s586_s6] ss:$0 sm:$0xff] }
   0xa   :  { %v382_v54 = vld [vmem:[%s584_s4] ss:$0 sm:$0xff] }
   0xc   :  { %v384_v14 = vpop.eup %383 }
   0xd   :  { %v85_v15 = vmul.f32 32.0, %v384_v14  ;;  %vm89_vm1 = vweird.f32 %v384_v14 }
   0xf   :  { %v86_v16 = vsub.f32 1.0, %v85_v15 }
  0x11   :  { %364 = vmatmul.msk.f32.gmra.mxu0 %vm46_vm0, %v37_v5  ;;  %v87_v17 = vmul.f32 %v384_v14, %v86_v16  ;;  %v262_v16 = vld [vmem:[%s587_s7] sm:$0xff] }
  0x12   :  { %282 = vmatpush.msra.mxu3 %v262_v16 }
  0x13   :  { %v88_v18 = vadd.f32 %v384_v14, %v87_v17  ;;  %v263_v17 = vld [vmem:[%s587_s7 + $0x8] sm:$0xff] }
  0x14   :  { %305 = vmatpush.msrb.mxu3 %v263_v17 }
  0x15   :  { %v90_v19 = vsel %vm89_vm1, %v384_v14, %v88_v18 }
  0x86   :  { %v70_v7 = vpop.f32.mrf.mxu0 }
  0x87   :  { %v71_v8 = vadd.f32 %v378_v6, %v70_v7 }
  0x89   :  { %v78_v9 = vsel %vm46_vm0, %v71_v8, 0.0 }
  0x8a   :  { %79 = vadd.xlane.f32.xlu0 %v78_v9 }
  0x8e   :  { %v73_v10 = vpop.f32.mrf.mxu0 }
  0x8f   :  { %v74_v11 = vadd.f32 %v378_v6, %v73_v10 }
  0x91   :  { %v81_v12 = vsel %vm46_vm0, %v74_v11, 0.0 }
  0x92   :  { %82 = vadd.xlane.f32.xlu0 %v81_v12 }
  0xfd   :  { %v80_v20 = vpop.xlane.xlu0 %79 }
  0xfe   :  { %v91_v21 = vmul.f32 %v90_v19, %v80_v20 }
 0x100   :  { %v93_v22 = vsub.f32 %v71_v8, %v91_v21 }
 0x102   :  { %v95_v23 = vmul.f32 %v93_v22, %v93_v22 }
 0x104   :  { %v97_v24 = vsel %vm46_vm0, %v95_v23, 0.0 }
 0x105   :  { %98 = vadd.xlane.f32.xlu1 %v97_v24  ;;  %v83_v25 = vpop.xlane.xlu0 %82 }
 0x106   :  { %v92_v26 = vmul.f32 %v90_v19, %v83_v25 }
 0x108   :  { %v94_v27 = vsub.f32 %v74_v11, %v92_v26 }
 0x10a   :  { %v96_v28 = vmul.f32 %v94_v27, %v94_v27 }
 0x10c   :  { %v100_v29 = vsel %vm46_vm0, %v96_v28, 0.0 }
 0x10d   :  { %101 = vadd.xlane.f32.xlu1 %v100_v29  ;;  %v254_v29 = vld [vmem:[%s588_s8] sm:$0xff] }
 0x10e   :  { %vm256_vm13 = vcmp.ge.f32.partialorder %v254_v29, 0.15 }
 0x178   :  { %v99_v30 = vpop.xlane.xlu1 %98 }
 0x179   :  { %v103_v31 = vmul.f32 %v99_v30, %v90_v19 }
 0x17b   :  { %v105_v32 = vadd.f32 1e-05, %v103_v31 }
 0x17d   :  { %385 = vrsqrt.f32 %v105_v32  ;;  %vm113_vm3 = vweird.f32 %v105_v32 }
 0x180   :  { %v102_v33 = vpop.xlane.xlu1 %101 }
 0x181   :  { %v104_v34 = vmul.f32 %v102_v33, %v90_v19 }
 0x183   :  { %v386_v35 = vpop.eup %385  ;;  %v106_v36 = vadd.f32 1e-05, %v104_v34 }
 0x184   :  { %v108_v37 = vmul.f32 %v386_v35, %v105_v32  ;;  %vm114_vm2 = vweird.f32 %v386_v35 }
 0x185   :  { %387 = vrsqrt.f32 %v106_v36  ;;  %vm115_vm4 = vmor %vm113_vm3, %vm114_vm2  ;;  %vm123_vm6 = vweird.f32 %v106_v36 }
 0x186   :  { %v109_v38 = vmul.f32 %v386_v35, %v108_v37 }
 0x188   :  { %v110_v39 = vmul.f32 0.5, %v109_v38 }
 0x18a   :  { %v111_v40 = vsub.f32 1.5, %v110_v39 }
 0x18b   :  { %v388_v41 = vpop.eup %387 }
 0x18c   :  { %v112_v42 = vmul.f32 %v386_v35, %v111_v40  ;;  %v118_v43 = vmul.f32 %v388_v41, %v106_v36  ;;  %vm124_vm5 = vweird.f32 %v388_v41 }
 0x18d   :  { %vm125_vm7 = vmor %vm123_vm6, %vm124_vm5 }
 0x18e   :  { %v119_v45 = vmul.f32 %v388_v41, %v118_v43  ;;  %v116_v46 = vsel %vm115_vm4, %v386_v35, %v112_v42  ;;  %v255_v43 = vld [vmem:[%s588_s8 + $0x8] sm:$0xff]  ;;  %s450_s8 = smov [#allocation2]  }
 0x18f   :  { %v127_v48 = vmul.f32 %v116_v46, %v93_v22  ;;  %vm257_vm3 = vcmp.ge.f32.partialorder %v255_v43, 0.15  ;;  %s333_s15 = sshll.u32 %s450_s8, 4  ;;  %s334_s15 = int_to_ptr.vmem [resolvable:$true] %s333_s15 }
 0x190   :  { %v120_v50 = vmul.f32 0.5, %v119_v45 }
 0x191   :  { %v144_v51 = vmul.f32 %v379_v44, %v127_v48  ;;  %v132_v53 = vmul.f32 %v381_v47, %v127_v48 }
 0x192   :  { %v121_v52 = vsub.f32 1.5, %v120_v50 }
 0x193   :  { %v149_v55 = vadd.f32 %v380_v49, %v144_v51  ;;  %v137_v57 = vadd.f32 %v382_v54, %v132_v53 }
 0x194   :  { %v122_v56 = vmul.f32 %v388_v41, %v121_v52 }
 0x195   :  { %365 = vmatpush.xpose.msk.msra.mxu1 %vm46_vm0, %v149_v55 }
 0x196   :  { %v126_v58 = vsel %vm125_vm7, %v388_v41, %v122_v56 }
 0x197   :  { %v128_v59 = vmul.f32 %v126_v58, %v94_v27 }
 0x198   :  { %366 = vmatmul.msk.f32.vlgmr.msra.gmra.mxu1 %vm46_vm0, %v137_v57 }
 0x199   :  { %v145_v60 = vmul.f32 %v379_v44, %v128_v59  ;;  %v133_v61 = vmul.f32 %v381_v47, %v128_v59 }
 0x19b   :  { %v150_v62 = vadd.f32 %v380_v49, %v145_v60  ;;  %v138_v63 = vadd.f32 %v382_v54, %v133_v61 }
 0x19d   :  { %367 = vmatpush.xpose.msk.msra.mxu2 %vm46_vm0, %v150_v62 }
 0x1a0   :  { %368 = vmatmul.msk.f32.vlgmr.msra.gmra.mxu2 %vm46_vm0, %v138_v63 }
 0x215   :  { %v174_v0 = vpop.f32.mrf.mxu1 }
 0x216   :  { %v203_v1 = vmul.f32 16.666666, %v174_v0 }
 0x218   :  { %v206_v2 = vsel %vm205_vm8, %v203_v1, -inf }
 0x219   :  { %207 = vmax.xlane.f32.xlu2 %v206_v2 }
 0x223   :  { %v200_v3 = vpop.f32.mrf.mxu2 }
 0x224   :  { %v204_v4 = vmul.f32 16.666666, %v200_v3 }
 0x226   :  { %v209_v5 = vsel %vm205_vm8, %v204_v4, -inf }
 0x227   :  { %210 = vmax.xlane.f32.xlu2 %v209_v5 }
 0x28c   :  { %v208_v6 = vpop.xlane.xlu2 %207 }
 0x28d   :  { %v212_v7 = vsub.f32 %v203_v1, %v208_v6 }
 0x28f   :  { %v214_v8 = vmul.f32 1.442695, %v212_v7 }
 0x291   :  { %389 = vpow2.f32 %v214_v8 }
 0x297   :  { %v390_v9 = vpop.eup %389 }
 0x298   :  { %v218_v10 = vsel %vm205_vm8, %v390_v9, 0.0 }
 0x299   :  { %219 = vadd.xlane.f32.xlu0 %v218_v10 }
 0x29a   :  { %v211_v11 = vpop.xlane.xlu2 %210 }
 0x29b   :  { %v213_v12 = vsub.f32 %v204_v4, %v211_v11 }
 0x29d   :  { %v216_v13 = vmul.f32 1.442695, %v213_v12 }
 0x29f   :  { %391 = vpow2.f32 %v216_v13 }
 0x2a5   :  { %v392_v14 = vpop.eup %391 }
 0x2a6   :  { %v221_v15 = vsel %vm205_vm8, %v392_v14, 0.0 }
 0x2a7   :  { %222 = vadd.xlane.f32.xlu1 %v221_v15 }
 0x30c   :  { %v220_v18 = vpop.xlane.xlu0 %219 }
 0x30d   :  { %393 = vrcp.f32 %v220_v18  ;;  %v235_v22 = vand.u32 2147483648, %v220_v18  ;;  %v233_v24 = vand.u32 2147483647, %v220_v18  ;;  %vm229_vm10 = vweird.f32 %v220_v18 }
 0x30f   :  { %v236_v27 = vor.u32 1.1754944e-38, %v235_v22  ;;  %vm234_vm12 = vcmp.eq.f32.partialorder %v233_v24, 8.507059e+37 }
 0x313   :  { %v394_v19 = vpop.eup %393 }
 0x314   :  { %v225_v20 = vmul.f32 %v394_v19, %v220_v18  ;;  %vm230_vm9 = vweird.f32 %v394_v19 }
 0x315   :  { %vm231_vm11 = vmor %vm229_vm10, %vm230_vm9 }
 0x316   :  { %v226_v21 = vsub.f32 1.0, %v225_v20 }
 0x318   :  { %v227_v23 = vmul.f32 %v394_v19, %v226_v21 }
 0x31a   :  { %v228_v25 = vadd.f32 %v394_v19, %v227_v23  ;;  %v223_v26 = vpop.xlane.xlu1 %222 }
 0x31b   :  { %395 = vrcp.f32 %v223_v26  ;;  %v250_v37 = vand.u32 2147483648, %v223_v26  ;;  %v248_v39 = vand.u32 2147483647, %v223_v26  ;;  %vm244_vm15 = vweird.f32 %v223_v26 }
 0x31c   :  { %v232_v28 = vsel %vm231_vm11, %v394_v19, %v228_v25 }
 0x31d   :  { %v237_v30 = vsel %vm234_vm12, %v236_v27, %v232_v28  ;;  %v251_v41 = vor.u32 1.1754944e-38, %v250_v37  ;;  %vm249_vm2 = vcmp.eq.f32.partialorder %v248_v39, 8.507059e+37 }
 0x31e   :  { %v238_v31 = vmul.f32 %v390_v9, %v237_v30 }
 0x320   :  { %v258_v32 = vmul.f32 1.1764706, %v238_v31 }
 0x321   :  { %v396_v33 = vpop.eup %395 }
 0x322   :  { %v240_v34 = vmul.f32 %v396_v33, %v223_v26  ;;  %v260_v35 = vsel %vm256_vm13, %v258_v32, 0.0  ;;  %vm245_vm14 = vweird.f32 %v396_v33 }
 0x323   :  { %369 = vmatmul.msk.f32.vlgmr.msra.gmra.mxu3 %vm205_vm8, %v260_v35  ;;  %vm246_vm1 = vmor %vm244_vm15, %vm245_vm14 }
 0x324   :  { %v241_v36 = vsub.f32 1.0, %v240_v34 }
 0x326   :  { %v242_v38 = vmul.f32 %v396_v33, %v241_v36 }
 0x328   :  { %v243_v40 = vadd.f32 %v396_v33, %v242_v38 }
 0x32a   :  { %v247_v42 = vsel %vm246_vm1, %v396_v33, %v243_v40 }
 0x32b   :  { %v252_v44 = vsel %vm249_vm2, %v251_v41, %v247_v42 }
 0x32c   :  { %v253_v45 = vmul.f32 %v392_v14, %v252_v44 }
 0x32e   :  { %v259_v46 = vmul.f32 1.1764706, %v253_v45 }
 0x330   :  { %v261_v47 = vsel %vm257_vm3, %v259_v46, 0.0 }
 0x331   :  { %370 = vmatmul.msk.f32.vlgmr.msrb.gmra.mxu3 %vm205_vm8, %v261_v47 }
 0x3a6   :  { %v284_v48 = vpop.f32.mrf.mxu3 }
 0x3a7   :  { %310 = vst.msk [vmem:[#allocation2] sm:$0xff] %vm46_vm0, %v284_v48  ;;  %v312_v49 = vmul.f32 %v284_v48, %v284_v48 }
 0x3a9   :  { %v314_v52 = vsel %vm46_vm0, %v312_v49, 0.0 }
 0x3b4   :  { %v307_v50 = vpop.f32.mrf.mxu3 }
 0x3b5   :  { %311 = vst.msk [vmem:[#allocation2 + $0x8] sm:$0xff] %vm46_vm0, %v307_v50  ;;  %v313_v51 = vmul.f32 %v307_v50, %v307_v50 }
 0x3b6   :  { %341 = dma.vmem_to_hbm [thread:$0]  %s334_s15, 256, %s336_s18, [#allocation3], %s451_s19, %s451_s19, %s452_s20  }
 0x3b7   :  { %v315_v53 = vsel %vm46_vm0, %v313_v51, 0.0  ;;  %vm327_vm0 = vcmask 0  }
 0x3b8   :  { %v316_v54 = vadd.f32 %v315_v53, %v314_v52 }
 0x3ba   :  { %317 = vadd.xlane.f32.xlu2 %v316_v54 }
 0x42d   :  { %v318_v55 = vpop.xlane.xlu2 %317 }
 0x42e   :  { %v319_v56 = vrot.slane %v318_v55, 4 }
 0x430   :  { %v320_v57 = vadd.f32 %v319_v56, %v318_v55 }
 0x432   :  { %v321_v58 = vrot.slane %v320_v57, 2 }
 0x434   :  { %v322_v59 = vadd.f32 %v321_v58, %v320_v57 }
 0x436   :  { %v323_v60 = vrot.slane %v322_v59, 1 }
 0x438   :  { %v324_v61 = vadd.f32 %v323_v60, %v322_v59 }
 0x43a   :  { %371 = vpush %v324_v61 }
 0x46b   :  { %s372_s9 = spop %371 }
 0x46c   :  { %v326_v62 = vstv %s372_s9 }
 0x46d   :  { %328 = vst.msk [vmem:[#allocation4] sm:$0x1] %vm327_vm0, %v326_v62 }
 0x46e   :  { %352 = dma.vmem_to_hbm [thread:$0]  %s348_s22, 16, %s350_s25, [#allocation5]  }
 0x46f   :  { %445 = dma.done.wait [#allocation3], 256  }
 0x470   :  { %446 = vsyncadd [#allocation3], 4294967040 }
 0x471   :  { %447 = dma.done.wait [#allocation5], 16  }
 0x472   :  { %448 = vsyncadd [#allocation5], 4294967280 }
 0x473   :  { %361 = vsyncpa [#allocation3], 1 }
 0x474   :  { %362 = vsyncpa [#allocation5], 1 }

</bundles_post_ra>
